<compile_context>
chip_gen: v7x
topology: tpu7x:2x2x1
jax: 0.10.0
libtpu: 0.0.40
codegen_flags: <defaults>
</compile_context>

<pallas_src>
import numpy as np
import jax
import jax.numpy as jnp
from jax.experimental import pallas as pl
from jax.experimental.pallas import tpu as pltpu


POOL_SIZES = (1, 2, 4)   # AdaptiveAvgPool2d output sizes of the three branches


# ----------------------------------------------------------------------------
# Pallas kernel: one grid step processes one batch element entirely in VMEM.
# ----------------------------------------------------------------------------
def _make_sppm_kernel(H, W):
    HW = H * W
    base = W + 1   # flat zero-halo width on each side of the conv scratch

    def kernel(x_ref,       # (1, Cin, HW)           input, flattened spatial
               pT_ref,      # (HW, 21)  bf16         stacked pooling operators^T
               u_ref,       # (21, HW)  bf16         stacked upsample operators
               wb_ref,      # (3, Cinter, Cin) f32   1x1 conv weights (BN folded)
               bb_ref,      # (3, Cinter, 1)   f32   BN biases
               wout_ref,    # (Cout, 9*Cinter) bf16  3x3 conv weights (BN folded)
               bout_ref,    # (Cout, 1)        f32   BN bias
               hmask_ref,   # (2, HW)          f32   left/right border masks
               o_ref,       # (1, Cout, HW)
               pad_ref):    # scratch (Cinter, HW + 2*(W+1)) f32
        Cinter = wb_ref.shape[1]

        # ---- pooled features of all three branches: one lane-dense matmul ---
        x_bf = x_ref[0].astype(jnp.bfloat16)                     # (Cin, HW)
        pooled = jnp.dot(x_bf, pT_ref[...],
                         preferred_element_type=jnp.float32)     # (Cin, 21)

        # ---- per-branch 1x1 conv (BN scale folded) + bias + ReLU ------------
        feats = []
        col = 0
        for bi, k in enumerate(POOL_SIZES):
            kk = k * k
            f = jnp.dot(wb_ref[bi], pooled[:, col:col + kk],
                        preferred_element_type=jnp.float32)      # (Cinter, kk)
            feats.append(jnp.maximum(f + bb_ref[bi], 0.0))
            col += kk
        feat_all = jnp.concatenate(feats, axis=1)                # (Cinter, 21)

        # ---- bilinear upsample + sum over branches: one matmul --------------
        up = jnp.dot(feat_all.astype(jnp.bfloat16), u_ref[...],
                     preferred_element_type=jnp.float32)         # (Cinter, HW)

        # ---- covout: 3x3 same conv -> BN(folded) -> ReLU --------------------
        # Flat zero-halo buffer: only the halo is (re)zeroed, interior is the
        # branch sum.  Tap (dy,dx) is then just a static lane-slice.
        pad_ref[:, :base] = jnp.zeros((Cinter, base), jnp.float32)
        pad_ref[:, base + HW:] = jnp.zeros((Cinter, base), jnp.float32)
        pad_ref[:, base:base + HW] = up

        mask_l = hmask_ref[0:1, :]   # 1.0 where reading column w-1 is in-bounds
        mask_r = hmask_ref[1:2, :]   # 1.0 where reading column w+1 is in-bounds

        taps = []
        for dy in (-1, 0, 1):
            for dx in (-1, 0, 1):
                s = dy * W + dx
                t = pad_ref[:, base + s:base + s + HW]           # (Cinter, HW)
                if dx == -1:
                    t = t * mask_l
                elif dx == 1:
                    t = t * mask_r
                taps.append(t)
        patches = jnp.concatenate(taps, axis=0)                  # (9*Cinter, HW)

        y = jnp.dot(wout_ref[...], patches.astype(jnp.bfloat16),
                    preferred_element_type=jnp.float32)          # (Cout, HW)
        o_ref[0] = jnp.maximum(y + bout_ref[...], 0.0).astype(o_ref.dtype)

    return kernel


# ----------------------------------------------------------------------------
# Wrapper
# ----------------------------------------------------------------------------
def sppm_forward(x, params):
    N, Cin, H, W = x.shape
    HW = H * W
    Cinter = params["Wb"].shape[1]
    Cout = params["Wout_mat"].shape[0]
    x_flat = x.reshape(N, Cin, HW)

    def const_spec(arr):
        shp = arr.shape
        return pl.BlockSpec(shp, lambda b: (0,) * len(shp))

    out_flat = pl.pallas_call(
        _make_sppm_kernel(H, W),
        out_shape=jax.ShapeDtypeStruct((N, Cout, HW), jnp.float32),
        grid=(N,),
        in_specs=[
            pl.BlockSpec((1, Cin, HW), lambda b: (b, 0, 0)),
            const_spec(params["P_allT"]),
            const_spec(params["U_all"]),
            const_spec(params["Wb"]),
            const_spec(params["bb"]),
            const_spec(params["Wout_mat"]),
            const_spec(params["bout"]),
            const_spec(params["hmask"]),
        ],
        out_specs=pl.BlockSpec((1, Cout, HW), lambda b: (b, 0, 0)),
        scratch_shapes=[pltpu.VMEM((Cinter, HW + 2 * (W + 1)), jnp.float32)],
        compiler_params=pltpu.CompilerParams(
            dimension_semantics=("parallel",)),   # megacore sharding on v7x
    )(x_flat, params["P_allT"], params["U_all"], params["Wb"], params["bb"],
      params["Wout_mat"], params["bout"], params["hmask"])
    return out_flat.reshape(N, Cout, H, W)


# ----------------------------------------------------------------------------
# Host-side operator / parameter construction (deterministic, synthetic)
# ----------------------------------------------------------------------------
def _adaptive_pool_matrix(out_size, in_size):
    """nn.AdaptiveAvgPool along one axis as an (out, in) averaging matrix."""
    P = np.zeros((out_size, in_size), np.float32)
    for i in range(out_size):
        start = (i * in_size) // out_size
        end = -((-(i + 1) * in_size) // out_size)     # ceil
        P[i, start:end] = 1.0 / (end - start)
    return P


def _interp_matrix(out_size, in_size):
    """PyTorch bilinear upsample (align_corners=False) as an (out, in) matrix."""
    scale = in_size / out_size
    d = np.arange(out_size)
    src = (d + 0.5) * scale - 0.5
    src = np.maximum(src, 0.0)
    i0 = np.minimum(np.floor(src).astype(np.int64), in_size - 1)
    i1 = np.minimum(i0 + 1, in_size - 1)
    l1 = src - i0
    l0 = 1.0 - l1
    A = np.zeros((out_size, in_size), np.float32)
    A[d, i0] += l0
    A[d, i1] += l1
    return A


def make_params(key, in_ch, inter_ch, out_ch, H, W):
    HW = H * W
    keys = jax.random.split(key, 2 * len(POOL_SIZES) + 2)

    def bn_fold(k, c):
        k1, k2, k3, k4 = jax.random.split(k, 4)
        gamma = 1.0 + 0.1 * jax.random.normal(k1, (c,), jnp.float32)
        beta = 0.1 * jax.random.normal(k2, (c,), jnp.float32)
        mean = 0.1 * jax.random.normal(k3, (c,), jnp.float32)
        var = jax.random.uniform(k4, (c,), jnp.float32, minval=0.5, maxval=1.5)
        scale = gamma / jnp.sqrt(var + 1e-5)
        bias = beta - mean * scale
        return scale, bias

    P_blocks, U_blocks, Wb_list, bb_list, raw_branches = [], [], [], [], []
    for bi, k in enumerate(POOL_SIZES):
        Wk = 0.3 * jax.random.normal(keys[2 * bi], (inter_ch, in_ch), jnp.float32)
        sk, bk = bn_fold(keys[2 * bi + 1], inter_ch)
        Ph = _adaptive_pool_matrix(k, H)
        Pw = _adaptive_pool_matrix(k, W)
        Uh = _interp_matrix(H, k)
        Uw = _interp_matrix(W, k)
        P_blocks.append(np.kron(Ph, Pw).T)        # (HW, k*k)
        U_blocks.append(np.kron(Uh, Uw).T)        # (k*k, HW)
        Wb_list.append(sk[:, None] * Wk)          # fold BN scale into 1x1 conv
        bb_list.append(bk[:, None])
        raw_branches.append(dict(Ph=jnp.asarray(Ph), Pw=jnp.asarray(Pw),
                                 Uh=jnp.asarray(Uh), Uw=jnp.asarray(Uw),
                                 Wk=Wk, sk=sk, bk=bk))

    Wout = 0.3 * jax.random.normal(keys[-2], (out_ch, inter_ch, 3, 3),
                                   jnp.float32)
    sout, bout = bn_fold(keys[-1], out_ch)
    Wout_folded = sout[:, None, None, None] * Wout
    # (Cout, 3, 3, Cinter) -> (Cout, 9*Cinter); column order (ky*3+kx)*Ci + c
    Wout_mat = jnp.transpose(Wout_folded, (0, 2, 3, 1)).reshape(
        out_ch, 9 * inter_ch)

    # horizontal-border validity masks for the flattened 3x3 conv taps
    wpos = np.arange(HW) % W
    hmask = np.stack([(wpos >= 1).astype(np.float32),        # reading w-1 ok
                      (wpos <= W - 2).astype(np.float32)])   # reading w+1 ok

    kernel_params = dict(
        P_allT=jnp.asarray(np.concatenate(P_blocks, axis=1), jnp.bfloat16),
        U_all=jnp.asarray(np.concatenate(U_blocks, axis=0), jnp.bfloat16),
        Wb=jnp.stack(Wb_list),                    # (3, Cinter, Cin)  f32
        bb=jnp.stack(bb_list),                    # (3, Cinter, 1)    f32
        Wout_mat=Wout_mat.astype(jnp.bfloat16),   # (Cout, 9*Cinter)
        bout=bout.reshape(out_ch, 1),             # (Cout, 1)         f32
        hmask=jnp.asarray(hmask),                 # (2, HW)           f32
    )
    raw = dict(branches=raw_branches, Wout=Wout, sout=sout, bout=bout)
    return kernel_params, raw


# ----------------------------------------------------------------------------
# Pure-JAX f32 reference (unfolded BN, separable pool/upsample, explicit conv)
# ----------------------------------------------------------------------------
def sppm_reference(x, raw):
    N, Cin, H, W = x.shape
    out = None
    for br in raw["branches"]:
        pooled = jnp.einsum('kh,nchw->nckw', br["Ph"], x)
        pooled = jnp.einsum('lw,nckw->nckl', br["Pw"], pooled)
        feat = jnp.einsum('oc,nckl->nokl', br["Wk"], pooled)
        feat = feat * br["sk"][None, :, None, None] \
             + br["bk"][None, :, None, None]
        feat = jnp.maximum(feat, 0.0)
        up = jnp.einsum('hk,nokl->nohl', br["Uh"], feat)
        up = jnp.einsum('wl,nohl->nohw', br["Uw"], up)
        out = up if out is None else out + up
    xp = jnp.pad(out, ((0, 0), (0, 0), (1, 1), (1, 1)))
    y = 0.0
    for ky in range(3):
        for kx in range(3):
            y = y + jnp.einsum('oc,nchw->nohw', raw["Wout"][:, :, ky, kx],
                               xp[:, :, ky:ky + H, kx:kx + W])
    y = y * raw["sout"][None, :, None, None] + raw["bout"][None, :, None, None]
    return jnp.maximum(y, 0.0)


# ----------------------------------------------------------------------------
if __name__ == "__main__":
    N, in_ch, inter_ch, out_ch = 2, 4, 4, 8
    H = W = 16

    key = jax.random.PRNGKey(0)
    kx, kp = jax.random.split(key)
    x = jax.random.normal(kx, (N, in_ch, H, W), jnp.float32)
    params, raw = make_params(kp, in_ch, inter_ch, out_ch, H, W)

    out = jax.block_until_ready(sppm_forward(x, params))
    ref = jax.block_until_ready(sppm_reference(x, raw))

    assert out.shape == (N, out_ch, H, W)
    # bf16 MXU operands (f32 accumulate) vs pure-f32 reference -> loose-ish tol
    np.testing.assert_allclose(np.asarray(out), np.asarray(ref),
                               rtol=2e-2, atol=2e-2)
    print("KERNEL_OK")
</pallas_src>

<mosaic_0001>
module attributes {stable_mosaic.version = 11 : i64} {
  func.func @kernel(%arg0: i32, %arg1: memref<1x4x256xf32, #tpu.memory_space<vmem>>, %arg2: memref<256x21xbf16, #tpu.memory_space<vmem>>, %arg3: memref<21x256xbf16, #tpu.memory_space<vmem>>, %arg4: memref<3x4x4xf32, #tpu.memory_space<vmem>>, %arg5: memref<3x4x1xf32, #tpu.memory_space<vmem>>, %arg6: memref<8x36xbf16, #tpu.memory_space<vmem>>, %arg7: memref<8x1xf32, #tpu.memory_space<vmem>>, %arg8: memref<2x256xf32, #tpu.memory_space<vmem>>, %arg9: memref<1x8x256xf32, #tpu.memory_space<vmem>>, %arg10: memref<4x290xf32, #tpu.memory_space<vmem>>) attributes {dimension_semantics = [#tpu.dimension_semantics<parallel>], iteration_bounds = array<i64: 2>, scalar_prefetch = 0 : i64, scratch_operands = 1 : i64, tpu.core_type = #tpu.core_type<tc>, window_params = [{transform_indices = @transform_0, window_bounds = array<i64: 1, 4, 256>}, {pipeline_mode = #tpu.pipeline_mode<synchronous>, transform_indices = @transform_1, window_bounds = array<i64: 256, 21>}, {pipeline_mode = #tpu.pipeline_mode<synchronous>, transform_indices = @transform_2, window_bounds = array<i64: 21, 256>}, {pipeline_mode = #tpu.pipeline_mode<synchronous>, transform_indices = @transform_3, window_bounds = array<i64: 3, 4, 4>}, {pipeline_mode = #tpu.pipeline_mode<synchronous>, transform_indices = @transform_4, window_bounds = array<i64: 3, 4, 1>}, {pipeline_mode = #tpu.pipeline_mode<synchronous>, transform_indices = @transform_5, window_bounds = array<i64: 8, 36>}, {pipeline_mode = #tpu.pipeline_mode<synchronous>, transform_indices = @transform_6, window_bounds = array<i64: 8, 1>}, {pipeline_mode = #tpu.pipeline_mode<synchronous>, transform_indices = @transform_7, window_bounds = array<i64: 2, 256>}, {transform_indices = @transform_8, window_bounds = array<i64: 1, 8, 256>}]} {
    %c0 = arith.constant 0 : index
    %c0_0 = arith.constant 0 : index
    %c0_1 = arith.constant 0 : index
    %0 = vector.load %arg1[%c0, %c0_0, %c0_1] : memref<1x4x256xf32, #tpu.memory_space<vmem>>, vector<1x4x256xf32>
    %1 = vector.shape_cast %0 : vector<1x4x256xf32> to vector<4x256xf32>
    %2 = arith.truncf %1 : vector<4x256xf32> to vector<4x256xbf16>
    %c0_2 = arith.constant 0 : index
    %c0_3 = arith.constant 0 : index
    %3 = vector.load %arg2[%c0_2, %c0_3] : memref<256x21xbf16, #tpu.memory_space<vmem>>, vector<256x21xbf16>
    %cst = arith.constant dense<0.000000e+00> : vector<4x21xf32>
    %4 = tpu.matmul %2, %3, %cst {dimension_numbers = #tpu.dot_dimension_numbers<[1], [0], [0], [1], [0, 0, 1, 1], [], []>} : vector<4x256xbf16>, vector<256x21xbf16>, vector<4x21xf32> -> vector<4x21xf32>
    %c0_4 = arith.constant 0 : index
    %c0_5 = arith.constant 0 : index
    %c0_6 = arith.constant 0 : index
    %5 = vector.load %arg4[%c0_4, %c0_5, %c0_6] : memref<3x4x4xf32, #tpu.memory_space<vmem>>, vector<1x4x4xf32>
    %6 = vector.shape_cast %5 : vector<1x4x4xf32> to vector<4x4xf32>
    %7 = vector.extract_strided_slice %4 {offsets = [0, 0], sizes = [4, 1], strides = [1, 1]} : vector<4x21xf32> to vector<4x1xf32>
    %cst_7 = arith.constant dense<0.000000e+00> : vector<4x1xf32>
    %8 = tpu.matmul %6, %7, %cst_7 {dimension_numbers = #tpu.dot_dimension_numbers<[1], [0], [0], [1], [0, 0, 1, 1], [], []>} : vector<4x4xf32>, vector<4x1xf32>, vector<4x1xf32> -> vector<4x1xf32>
    %c0_8 = arith.constant 0 : index
    %c0_9 = arith.constant 0 : index
    %c0_10 = arith.constant 0 : index
    %9 = vector.load %arg5[%c0_8, %c0_9, %c0_10] : memref<3x4x1xf32, #tpu.memory_space<vmem>>, vector<1x4x1xf32>
    %10 = vector.shape_cast %9 : vector<1x4x1xf32> to vector<4x1xf32>
    %11 = arith.addf %8, %10 : vector<4x1xf32>
    %cst_11 = arith.constant 0.000000e+00 : f32
    %12 = vector.broadcast %cst_11 : f32 to vector<4x1xf32>
    %13 = arith.maximumf %11, %12 : vector<4x1xf32>
    %c1 = arith.constant 1 : index
    %c0_12 = arith.constant 0 : index
    %c0_13 = arith.constant 0 : index
    %14 = vector.load %arg4[%c1, %c0_12, %c0_13] : memref<3x4x4xf32, #tpu.memory_space<vmem>>, vector<1x4x4xf32>
    %15 = vector.shape_cast %14 : vector<1x4x4xf32> to vector<4x4xf32>
    %16 = vector.extract_strided_slice %4 {offsets = [0, 1], sizes = [4, 4], strides = [1, 1]} : vector<4x21xf32> to vector<4x4xf32>
    %cst_14 = arith.constant dense<0.000000e+00> : vector<4x4xf32>
    %17 = tpu.matmul %15, %16, %cst_14 {dimension_numbers = #tpu.dot_dimension_numbers<[1], [0], [0], [1], [0, 0, 1, 1], [], []>} : vector<4x4xf32>, vector<4x4xf32>, vector<4x4xf32> -> vector<4x4xf32>
    %c1_15 = arith.constant 1 : index
    %c0_16 = arith.constant 0 : index
    %c0_17 = arith.constant 0 : index
    %18 = vector.load %arg5[%c1_15, %c0_16, %c0_17] : memref<3x4x1xf32, #tpu.memory_space<vmem>>, vector<1x4x1xf32>
    %19 = vector.shape_cast %18 : vector<1x4x1xf32> to vector<4x1xf32>
    %20 = vector.broadcast %19 : vector<4x1xf32> to vector<4x4xf32>
    %21 = arith.addf %17, %20 : vector<4x4xf32>
    %cst_18 = arith.constant 0.000000e+00 : f32
    %22 = vector.broadcast %cst_18 : f32 to vector<4x4xf32>
    %23 = arith.maximumf %21, %22 : vector<4x4xf32>
    %c2 = arith.constant 2 : index
    %c0_19 = arith.constant 0 : index
    %c0_20 = arith.constant 0 : index
    %24 = vector.load %arg4[%c2, %c0_19, %c0_20] : memref<3x4x4xf32, #tpu.memory_space<vmem>>, vector<1x4x4xf32>
    %25 = vector.shape_cast %24 : vector<1x4x4xf32> to vector<4x4xf32>
    %26 = vector.extract_strided_slice %4 {offsets = [0, 5], sizes = [4, 16], strides = [1, 1]} : vector<4x21xf32> to vector<4x16xf32>
    %cst_21 = arith.constant dense<0.000000e+00> : vector<4x16xf32>
    %27 = tpu.matmul %25, %26, %cst_21 {dimension_numbers = #tpu.dot_dimension_numbers<[1], [0], [0], [1], [0, 0, 1, 1], [], []>} : vector<4x4xf32>, vector<4x16xf32>, vector<4x16xf32> -> vector<4x16xf32>
    %c2_22 = arith.constant 2 : index
    %c0_23 = arith.constant 0 : index
    %c0_24 = arith.constant 0 : index
    %28 = vector.load %arg5[%c2_22, %c0_23, %c0_24] : memref<3x4x1xf32, #tpu.memory_space<vmem>>, vector<1x4x1xf32>
    %29 = vector.shape_cast %28 : vector<1x4x1xf32> to vector<4x1xf32>
    %30 = vector.broadcast %29 : vector<4x1xf32> to vector<4x16xf32>
    %31 = arith.addf %27, %30 : vector<4x16xf32>
    %cst_25 = arith.constant 0.000000e+00 : f32
    %32 = vector.broadcast %cst_25 : f32 to vector<4x16xf32>
    %33 = arith.maximumf %31, %32 : vector<4x16xf32>
    %34 = tpu.concatenate %13, %23, %33 in 1 : vector<4x1xf32>, vector<4x4xf32>, vector<4x16xf32> -> vector<4x21xf32>
    %35 = arith.truncf %34 : vector<4x21xf32> to vector<4x21xbf16>
    %c0_26 = arith.constant 0 : index
    %c0_27 = arith.constant 0 : index
    %36 = vector.load %arg3[%c0_26, %c0_27] : memref<21x256xbf16, #tpu.memory_space<vmem>>, vector<21x256xbf16>
    %cst_28 = arith.constant dense<0.000000e+00> : vector<4x256xf32>
    %37 = tpu.matmul %35, %36, %cst_28 {dimension_numbers = #tpu.dot_dimension_numbers<[1], [0], [0], [1], [0, 0, 1, 1], [], []>} : vector<4x21xbf16>, vector<21x256xbf16>, vector<4x256xf32> -> vector<4x256xf32>
    %cst_29 = arith.constant 0.000000e+00 : f32
    %38 = vector.broadcast %cst_29 : f32 to vector<4x17xf32>
    %c0_30 = arith.constant 0 : index
    %c0_31 = arith.constant 0 : index
    %39 = vector.load %arg10[%c0_30, %c0_31] : memref<4x290xf32, #tpu.memory_space<vmem>>, vector<4x17xf32>
    tpu.vector_store %arg10[%c0_30, %c0_31], %38 {strides = array<i32>} : memref<4x290xf32, #tpu.memory_space<vmem>>, vector<4x17xf32>,
    %cst_32 = arith.constant 0.000000e+00 : f32
    %40 = vector.broadcast %cst_32 : f32 to vector<4x17xf32>
    %c0_33 = arith.constant 0 : index
    %c273 = arith.constant 273 : index
    %41 = vector.load %arg10[%c0_33, %c273] : memref<4x290xf32, #tpu.memory_space<vmem>>, vector<4x17xf32>
    tpu.vector_store %arg10[%c0_33, %c273], %40 {strides = array<i32>} : memref<4x290xf32, #tpu.memory_space<vmem>>, vector<4x17xf32>,
    %c0_34 = arith.constant 0 : index
    %c17 = arith.constant 17 : index
    %42 = vector.load %arg10[%c0_34, %c17] : memref<4x290xf32, #tpu.memory_space<vmem>>, vector<4x256xf32>
    tpu.vector_store %arg10[%c0_34, %c17], %37 {strides = array<i32>} : memref<4x290xf32, #tpu.memory_space<vmem>>, vector<4x256xf32>,
    %c0_35 = arith.constant 0 : index
    %c0_36 = arith.constant 0 : index
    %43 = vector.load %arg8[%c0_35, %c0_36] : memref<2x256xf32, #tpu.memory_space<vmem>>, vector<1x256xf32>
    %c1_37 = arith.constant 1 : index
    %c0_38 = arith.constant 0 : index
    %44 = vector.load %arg8[%c1_37, %c0_38] : memref<2x256xf32, #tpu.memory_space<vmem>>, vector<1x256xf32>
    %c0_39 = arith.constant 0 : index
    %c0_40 = arith.constant 0 : index
    %45 = vector.load %arg10[%c0_39, %c0_40] : memref<4x290xf32, #tpu.memory_space<vmem>>, vector<4x256xf32>
    %46 = vector.broadcast %43 : vector<1x256xf32> to vector<4x256xf32>
    %47 = arith.mulf %45, %46 : vector<4x256xf32>
    %c0_41 = arith.constant 0 : index
    %c1_42 = arith.constant 1 : index
    %48 = vector.load %arg10[%c0_41, %c1_42] : memref<4x290xf32, #tpu.memory_space<vmem>>, vector<4x256xf32>
    %c0_43 = arith.constant 0 : index
    %c2_44 = arith.constant 2 : index
    %49 = vector.load %arg10[%c0_43, %c2_44] : memref<4x290xf32, #tpu.memory_space<vmem>>, vector<4x256xf32>
    %50 = vector.broadcast %44 : vector<1x256xf32> to vector<4x256xf32>
    %51 = arith.mulf %49, %50 : vector<4x256xf32>
    %c0_45 = arith.constant 0 : index
    %c16 = arith.constant 16 : index
    %52 = vector.load %arg10[%c0_45, %c16] : memref<4x290xf32, #tpu.memory_space<vmem>>, vector<4x256xf32>
    %53 = vector.broadcast %43 : vector<1x256xf32> to vector<4x256xf32>
    %54 = arith.mulf %52, %53 : vector<4x256xf32>
    %c0_46 = arith.constant 0 : index
    %c17_47 = arith.constant 17 : index
    %55 = vector.load %arg10[%c0_46, %c17_47] : memref<4x290xf32, #tpu.memory_space<vmem>>, vector<4x256xf32>
    %c0_48 = arith.constant 0 : index
    %c18 = arith.constant 18 : index
    %56 = vector.load %arg10[%c0_48, %c18] : memref<4x290xf32, #tpu.memory_space<vmem>>, vector<4x256xf32>
    %57 = vector.broadcast %44 : vector<1x256xf32> to vector<4x256xf32>
    %58 = arith.mulf %56, %57 : vector<4x256xf32>
    %c0_49 = arith.constant 0 : index
    %c32 = arith.constant 32 : index
    %59 = vector.load %arg10[%c0_49, %c32] : memref<4x290xf32, #tpu.memory_space<vmem>>, vector<4x256xf32>
    %60 = vector.broadcast %43 : vector<1x256xf32> to vector<4x256xf32>
    %61 = arith.mulf %59, %60 : vector<4x256xf32>
    %c0_50 = arith.constant 0 : index
    %c33 = arith.constant 33 : index
    %62 = vector.load %arg10[%c0_50, %c33] : memref<4x290xf32, #tpu.memory_space<vmem>>, vector<4x256xf32>
    %c0_51 = arith.constant 0 : index
    %c34 = arith.constant 34 : index
    %63 = vector.load %arg10[%c0_51, %c34] : memref<4x290xf32, #tpu.memory_space<vmem>>, vector<4x256xf32>
    %64 = vector.broadcast %44 : vector<1x256xf32> to vector<4x256xf32>
    %65 = arith.mulf %63, %64 : vector<4x256xf32>
    %66 = tpu.concatenate %47, %48, %51, %54, %55, %58, %61, %62, %65 in 0 : vector<4x256xf32>, vector<4x256xf32>, vector<4x256xf32>, vector<4x256xf32>, vector<4x256xf32>, vector<4x256xf32>, vector<4x256xf32>, vector<4x256xf32>, vector<4x256xf32> -> vector<36x256xf32>
    %c0_52 = arith.constant 0 : index
    %c0_53 = arith.constant 0 : index
    %67 = vector.load %arg6[%c0_52, %c0_53] : memref<8x36xbf16, #tpu.memory_space<vmem>>, vector<8x36xbf16>
    %68 = arith.truncf %66 : vector<36x256xf32> to vector<36x256xbf16>
    %cst_54 = arith.constant dense<0.000000e+00> : vector<8x256xf32>
    %69 = tpu.matmul %67, %68, %cst_54 {dimension_numbers = #tpu.dot_dimension_numbers<[1], [0], [0], [1], [0, 0, 1, 1], [], []>} : vector<8x36xbf16>, vector<36x256xbf16>, vector<8x256xf32> -> vector<8x256xf32>
    %c0_55 = arith.constant 0 : index
    %c0_56 = arith.constant 0 : index
    %70 = vector.load %arg7[%c0_55, %c0_56] : memref<8x1xf32, #tpu.memory_space<vmem>>, vector<8x1xf32>
    %71 = vector.broadcast %70 : vector<8x1xf32> to vector<8x256xf32>
    %72 = arith.addf %69, %71 : vector<8x256xf32>
    %cst_57 = arith.constant 0.000000e+00 : f32
    %73 = vector.broadcast %cst_57 : f32 to vector<8x256xf32>
    %74 = arith.maximumf %72, %73 : vector<8x256xf32>
    %c0_58 = arith.constant 0 : index
    %c0_59 = arith.constant 0 : index
    %c0_60 = arith.constant 0 : index
    %75 = vector.load %arg9[%c0_58, %c0_59, %c0_60] : memref<1x8x256xf32, #tpu.memory_space<vmem>>, vector<1x8x256xf32>
    %76 = vector.shape_cast %75 : vector<1x8x256xf32> to vector<8x256xf32>
    %77 = vector.shape_cast %74 : vector<8x256xf32> to vector<1x8x256xf32>
    tpu.vector_store %arg9[%c0_58, %c0_59, %c0_60], %77 {strides = array<i32>} : memref<1x8x256xf32, #tpu.memory_space<vmem>>, vector<1x8x256xf32>,
    return
  }
  func.func @transform_0(%arg0: i32) -> (i32, i32, i32) {
    %c0_i32 = arith.constant 0 : i32
    %c0_i32_0 = arith.constant 0 : i32
    %c0_i32_1 = arith.constant 0 : i32
    return %arg0, %c0_i32, %c0_i32_0 : i32, i32, i32
  }
  func.func @transform_1(%arg0: i32) -> (i32, i32) {
    %c0_i32 = arith.constant 0 : i32
    %c0_i32_0 = arith.constant 0 : i32
    %c0_i32_1 = arith.constant 0 : i32
    return %c0_i32, %c0_i32_0 : i32, i32
  }
  func.func @transform_2(%arg0: i32) -> (i32, i32) {
    %c0_i32 = arith.constant 0 : i32
    %c0_i32_0 = arith.constant 0 : i32
    %c0_i32_1 = arith.constant 0 : i32
    return %c0_i32, %c0_i32_0 : i32, i32
  }
  func.func @transform_3(%arg0: i32) -> (i32, i32, i32) {
    %c0_i32 = arith.constant 0 : i32
    %c0_i32_0 = arith.constant 0 : i32
    %c0_i32_1 = arith.constant 0 : i32
    %c0_i32_2 = arith.constant 0 : i32
    return %c0_i32, %c0_i32_0, %c0_i32_1 : i32, i32, i32
  }
  func.func @transform_4(%arg0: i32) -> (i32, i32, i32) {
    %c0_i32 = arith.constant 0 : i32
    %c0_i32_0 = arith.constant 0 : i32
    %c0_i32_1 = arith.constant 0 : i32
    %c0_i32_2 = arith.constant 0 : i32
    return %c0_i32, %c0_i32_0, %c0_i32_1 : i32, i32, i32
  }
  func.func @transform_5(%arg0: i32) -> (i32, i32) {
    %c0_i32 = arith.constant 0 : i32
    %c0_i32_0 = arith.constant 0 : i32
    %c0_i32_1 = arith.constant 0 : i32
    return %c0_i32, %c0_i32_0 : i32, i32
  }
  func.func @transform_6(%arg0: i32) -> (i32, i32) {
    %c0_i32 = arith.constant 0 : i32
    %c0_i32_0 = arith.constant 0 : i32
    %c0_i32_1 = arith.constant 0 : i32
    return %c0_i32, %c0_i32_0 : i32, i32
  }
  func.func @transform_7(%arg0: i32) -> (i32, i32) {
    %c0_i32 = arith.constant 0 : i32
    %c0_i32_0 = arith.constant 0 : i32
    %c0_i32_1 = arith.constant 0 : i32
    return %c0_i32, %c0_i32_0 : i32, i32
  }
  func.func @transform_8(%arg0: i32) -> (i32, i32, i32) {
    %c0_i32 = arith.constant 0 : i32
    %c0_i32_0 = arith.constant 0 : i32
    %c0_i32_1 = arith.constant 0 : i32
    return %arg0, %c0_i32, %c0_i32_0 : i32, i32, i32
  }
}

</mosaic_0001>

<bundles_post_ra>
// kernel: tpu_custom_call.1
= control target key start
LH: loop header
LB: loop body
LE: loop exit
PB: predicated region body
PF: predicated region fallthrough
CT: control target
= control target key end

     0   :  { %13 = vsyncpa [#allocation4], 0  ;;  %s1797_s0 = inlined_call_operand.vmem [shape: f32[2,4,256], index: 0, kind: input, shape index: {}]   ;;  %s1798_s1 = inlined_call_operand.vmem [shape: bf16[256,21], index: 1, kind: input, shape index: {}]   ;;  %s1799_s2 = inlined_call_operand.vmem [shape: bf16[21,256], index: 2, kind: input, shape index: {}]   ;;  %s1800_s3 = inlined_call_operand.vmem [shape: f32[3,4,4], index: 3, kind: input, shape index: {}]   ;;  %s1801_s4 = inlined_call_operand.vmem [shape: f32[3,4,1], index: 4, kind: input, shape index: {}]   ;;  %s1802_s5 = inlined_call_operand.vmem [shape: bf16[8,36], index: 5, kind: input, shape index: {}]   ;;  %s1803_s6 = inlined_call_operand.vmem [shape: f32[8,1], index: 6, kind: input, shape index: {}]   ;;  %s1804_s7 = inlined_call_operand.vmem [shape: f32[2,256], index: 7, kind: input, shape index: {}]   ;;  %s1805_s8 = inlined_call_operand.hbm [shape: f32[2,8,256], index: 8, kind: output, shape index: {}]  }
   0x1   :  { %15 = vsyncpa [#allocation4 + $0x1], 0  ;;  %s1523_s27 = smov 0   ;;  %s1525_s28 = smov 0  }
   0x2   :  { %s1527_s29 = smov 0   ;;  %s1529_s30 = smov 0  }
   0x3 LB: > { %s1544_s9 = sadd.s32 4294967295, %s1454_s30   ;;  %s1174_s10 = sadd.s32 4294967294, %s1454_s30   ;;  %s1454_s30 = sphi %s1529_s30, %s1811_s30   ;;  %s1450_s29 = sphi %s1527_s29, %s1810_s29   ;;  %s1446_s28 = sphi %s1525_s28, %s1809_s28   ;;  %s1442_s27 = sphi %s1523_s27, %s1808_s27  }
   0x4   : > { %s1548_s11 = sadd.s32 1, %s1454_s30   ;;  %s201_s12 = sadd.s32 1, %s1450_s29 }
   0x5   : > { %s198_s13 = ssub.s32 %s1454_s30, %s1548_s11  ;;  %p211_p0 = scmp.ne.s32.totalorder %s1450_s29, %s1446_s28 }
   0x6   : > { %p199_p1 = scmp.eq.s32.totalorder %s198_s13, 0  ;;  %p212_p2 = scmp.eq.s32.totalorder %s1544_s9, 1 }
   0x7   : > { %p217_p3 = scmp.ne.s32.totalorder %s1446_s28, %s1442_s27  ;;  %p218_p4 = scmp.eq.s32.totalorder %s1174_s10, 1 }
   0x8   : > { %s1559_s14 = scalar_select %p199_p1, %s1450_s29, %s201_s12  }
   0x9   : > { %p1561_p5 = por %p212_p2, %p211_p0  ;;  %p1565_p6 = por %p218_p4, %p217_p3 }
   0xa   : > { %p1177_p7 = scmp.ge.s32.totalorder %s1454_s30, 1  ;;  %p265_p8 = scmp.lt.s32.totalorder %s1454_s30, 3 }
   0xc   : > { %p266_p9 = pnand %p1177_p7, %p265_p8 }
   0xd   : > { %v1367_v0 = vld [vmem:[%s1798_s1 + $0x40] sm:$0xff] (!%p266_p9)   ;;  %v1369_v2 = vld [vmem:[%s1798_s1 + $0x48] sm:$0xff] (!%p266_p9)   ;;  %p299_p10 = scmp.lt.s32.totalorder (!%p266_p9), %s1544_s9, 1  ;;  %v1371_v4 = vld [vmem:[%s1798_s1 + $0x50] sm:$0xff] (!%p266_p9)   ;;  %v1456_v20 = vmov (!%p266_p9), 0.0   ;;  %vm1457_vm0 = vmmov (!%p266_p9), 0  }
   0xe   : > { %269 = sbr.rel (%p266_p9) target bundleno = 1440 (0x5a0), region = 52  ;;  %v1368_v1 = vld [vmem:[%s1798_s1] sm:$0xff] (!%p266_p9)   ;;  %1222 = vmatprep.subr.bf16.mxu0 (!%p266_p9), %v1367_v0  ;;  %v1370_v3 = vld [vmem:[%s1798_s1 + $0x8] sm:$0xff] (!%p266_p9)   ;;  %v1372_v5 = vld [vmem:[%s1798_s1 + $0x10] sm:$0xff] (!%p266_p9)   ;;  %1250 = vmatprep.subr.mxu1 (!%p266_p9), %v1456_v20  ;;  %v1458_v22 = vmov (!%p266_p9), 0   ;;  %vm485_vm1 = vcmask (!%p266_p9), 1043456   ;;  %v844_v0 = vlaneseq (!%p266_p9) }
   0xf   : > { %1223 = vmatpush3.bf16.msra.mxu0 (!%p266_p9), %v1368_v1  ;;  %v1373_v6 = vld [vmem:[%s1798_s1 + $0x58] sm:$0xff] (!%p266_p9)   ;;  %v1375_v8 = vld [vmem:[%s1798_s1 + $0x60] sm:$0xff] (!%p266_p9)   ;;  %v1377_v10 = vld [vmem:[%s1798_s1 + $0x68] sm:$0xff] (!%p266_p9)   ;;  %1252 = vmatprep.mubr.msk.f32.mxu1 (!%p266_p9), %vm1457_vm0, %v1456_v20  ;;  %vm481_vm2 = vcmask (!%p266_p9), 31744   ;;  %s1459_s21 = smov (!%p266_p9), 127   ;;  %s1460_s22 = smov (!%p266_p9), 123  }
  0x10   : > { %1224 = vmatprep.subr.bf16.mxu0 (!%p266_p9), %v1369_v2  ;;  %v1374_v7 = vld [vmem:[%s1798_s1 + $0x18] sm:$0xff] (!%p266_p9)   ;;  %v1376_v9 = vld [vmem:[%s1798_s1 + $0x20] sm:$0xff] (!%p266_p9)   ;;  %v1378_v13 = vld [vmem:[%s1798_s1 + $0x28] sm:$0xff] (!%p266_p9)   ;;  %1325 = vset.pattern.permute.xlu1 (!%p266_p9), %v1458_v22  ;;  %vm769_vm3 = vcmask (!%p266_p9), 1041408   ;;  %vm770_vm4 = vcmask (!%p266_p9), 1042432   ;;  %v1461_v40 = vmov (!%p266_p9), 65535  }
  0x11   : > { %v1379_v15 = vld [vmem:[%s1798_s1 + $0x70] sm:$0xff] (!%p266_p9)   ;;  %v1381_v17 = vld [vmem:[%s1798_s1 + $0x78] sm:$0xff] (!%p266_p9)   ;;  %v1200_v21 = vld [vmem:[%s1801_s4 + $0x4] sm:$0xf] (!%p266_p9)  ;;  %1366 = vset.pattern.permute.xlu0 (!%p266_p9), %v1458_v22  ;;  %v771_v41 = vsel (!%p266_p9), %vm769_vm3, 4294967295, %v1461_v40  ;;  %vm742_vm5 = vcmask (!%p266_p9), 7168  }
  0x12   : > { %v1380_v16 = vld [vmem:[%s1798_s1 + $0x30] sm:$0xff] (!%p266_p9)   ;;  %v1382_v18 = vld [vmem:[%s1798_s1 + $0x38] sm:$0xff] (!%p266_p9)   ;;  %566 = vperm.xlu1 (!%p266_p9), %1325, %v1200_v21   ;;  %v1204_v23 = vld [vmem:[%s1801_s4 + $0x8] sm:$0xf] (!%p266_p9)  ;;  %v772_v43 = vsel (!%p266_p9), %vm770_vm4, %v771_v41, 0  ;;  %vm744_vm6 = vcmask (!%p266_p9), 39936  }
  0x13   : > { %1225 = vmatpush3.bf16.msra.mxu0 (!%p266_p9), %v1370_v3  ;;  %v479_v28 = vld [vmem:[%s1800_s3] sm:$0xf] (!%p266_p9)  ;;  %v1199_v30 = vld [vmem:[%s1800_s3 + $0x4] sm:$0xf] (!%p266_p9)  ;;  %v1203_v32 = vld [vmem:[%s1800_s3 + $0x8] sm:$0xf] (!%p266_p9) }
  0x14   : > { %1226 = vmatprep.subr.bf16.mxu0 (!%p266_p9), %v1371_v4  ;;  %v1384_v34 = vld [vmem:[%s1799_s2] ss:$8 sps:$4 sm:$0xff] (!%p266_p9)   ;;  %v1386_v35 = vld [vmem:[%s1799_s2 + $0x4] ss:$8 sps:$4 sm:$0xff] (!%p266_p9)   ;;  %v749_v38 = vld [vmem:[%s1799_s2 + $0x10] sm:$0x77] (!%p266_p9) }
  0x15   : > { %s300_s10 = scalar_select %p299_p10, %s1544_s9, 1  ;;  %v1210_v39 = vcombine.high %v749_v38, %v749_v38  ;;  %v1209_v42 = vcombine.low %v749_v38, %v749_v38  ;;  %v480_v56 = vld [vmem:[%s1801_s4] sm:$0xf]  ;;  %vm765_vm7 = vcmask 171008   ;;  %v845_v1 = vshrl.u32 %v844_v0, 7 }
  0x16   : > { %653 = vperm.xlu1 %1325, %v1204_v23   ;;  %v1212_v4 = vld [vmem:[%s1804_s7 + $0x1] ss:$2 sm:$0x3]  ;;  %s1465_s17 = smov 32   ;;  %s1466_s18 = smov 34   ;;  %vm820_vm8 = vcmask 134144  }
  0x17   : > { %s1220_s19 = sshll.u32 %s300_s10, 3  ;;  %1227 = vmatpush3.bf16.msra.mxu0 %v1372_v5  ;;  %v777_v44 = vand.u32 %v1210_v39, %v772_v43  ;;  %v774_v45 = vand.u32 %v1209_v42, %v772_v43  ;;  %v846_v2 = vsub.s32 0, %v845_v1  ;;  %v850_v3 = vsub.s32 1, %v845_v1  ;;  %s1464_s10 = smov 2   ;;  %821 = vst.msk [vmem:[#allocation2] sm:$0xf] %vm820_vm8, %v1456_v20 }
  0x18   : > { %1228 = vmatprep.subr.bf16.mxu0 %v1373_v6  ;;  %s303_s26 = scalar_lea.vmem %s1797_s0, %s1220_s19  ;;  %s1462_s19 = smov 1   ;;  %vm822_vm9 = vcmask 273544   ;;  %vm834_vm10 = vcmask 1043592   ;;  %vm835_vm11 = vcmask 1047556   ;;  %vm830_vm12 = vcmask 138240  }
  0x19   : > { %v305_v11 = vld [vmem:[%s303_s26] sm:$0xff]  ;;  %v860_v5 = vrot.slane %v1212_v4, %v846_v2  ;;  %v864_v6 = vrot.slane %v1212_v4, %v850_v3  ;;  %823 = vst.msk [vmem:[#allocation2 + $0x8] sm:$0xf] %vm822_vm9, %v1456_v20  ;;  %s1467_s20 = smov 17   ;;  %vm836_vm13 = vmor %vm835_vm11, %vm834_vm10  ;;  %vm887_vm14 = vcmask 146432   ;;  %s1470_s23 = smov 111  }
  0x1a   : > { %v307_v12 = vcombine.high %v305_v11, %v305_v11  ;;  %v309_v19 = vpack.c.bf16 %v305_v11, %v305_v11  ;;  %vm869_vm15 = vcmask 15360   ;;  %s1471_s24 = smov 95   ;;  %s1472_s25 = smov 126   ;;  %vm905_vm4 = vcmask 277504  }
  0x1b   : > { %1229 = vmatpush3.bf16.msra.mxu0 %v1374_v7  ;;  %v865_v7 = vcombine.low %v860_v5, %v864_v6  ;;  %s1473_s26 = smov 110   ;;  %s1475_s12 = smov 96   ;;  %vm980_vm9 = vcmask 900096   ;;  %vm1005_vm10 = vcmask 777216   ;;  %vm994_vm11 = vcmask 785408  }
  0x1c   : > { %1230 = vmatprep.subr.bf16.mxu0 %v1375_v8  ;;  %v310_v14 = vpack.c.bf16 %v307_v12, %v307_v12  ;;  %v839_v8 = vld [vmem:[%s1804_s7] ss:$2 sm:$0x3]  ;;  %s1476_s13 = smov 94  }
  0x1e   : > { %471 = vmatprep.mubr.bf16.mxu0 %v310_v14 }
  0x1f   : > { %1231 = vmatpush3.bf16.msra.mxu0 %v1376_v9  ;;  %v847_v9 = vrot.slane %v839_v8, %v846_v2 }
  0x20   : > { %1232 = vmatprep.subr.bf16.mxu0 %v1377_v10  ;;  %v851_v10 = vrot.slane %v839_v8, %v850_v3 }
  0x22   : > { %v1678_v11 = vcombine.low %v847_v9, %v851_v10 }
  0x23   : > { %1233 = vmatpush3.bf16.msra.mxu0 %v1378_v13 }
  0x24   : > { %1234 = vmatprep.subr.bf16.mxu0 %v1379_v15 }
  0x27   : > { %1235 = vmatpush3.bf16.msra.mxu0 %v1380_v16 }
  0x28   : > { %1236 = vmatprep.subr.bf16.mxu0 %v1381_v17 }
  0x2b   : > { %1237 = vmatpush3.bf16.msra.mxu0 %v1382_v18 }
  0x2e   : > { %472 = vmatmul.mubr.bf16.vlgmr.msra.gmra.mrb[0].mxu0 %v309_v19 }
  0x91   : > { %v567_v46 = vpop.permute.xlu1 %566 }
  0x95   : > { %v654_v51 = vpop.permute.xlu1 %653 }
 0x101   : > { %v1238_v24 = vpop.f32.mrb[0].mxu0 }
 0x102   : > { %v1239_v25 = vpop.f32.mrb[1].mxu0 }
 0x103   : > { %v1240_v26 = vadd.f32 %v1239_v25, %v1238_v24  ;;  %v1241_v27 = vpop.f32.mrb[2].mxu0 }
 0x104   : > { %v1242_v29 = vpop.f32.mrb[3].mxu0 }
 0x105   : > { %569 = vrot.lane.b32.xlu0 %v1240_v26, %s1459_s21  ;;  %1251 = vmatpush3.msk.msra.mxu1 %vm485_vm1, %v1240_v26 }
 0x106   : > { %1253 = vmatmul.mubr.msk.f32.vlgmr.msra.gmra.mrb[0].mxu1 %vm481_vm2, %v479_v28  ;;  %1255 = vmatprep.subr.mxu1 %v1456_v20 }
 0x107   : > { %1257 = vmatprep.mubr.msk.f32.mxu1 %vm1457_vm0, %v1456_v20 }
 0x109   : > { %656 = vrot.lane.b32.xlu0 %v1240_v26, %s1460_s22  ;;  %s1463_s22 = smov 5  }
 0x177   : > { %v570_v31 = vpop.permute.xlu0 %569 }
 0x178   : > { %1256 = vmatpush3.msk.msra.mxu1 %vm485_vm1, %v570_v31 }
 0x179   : > { %1258 = vmatmul.mubr.msk.f32.vlgmr.msra.gmra.mrb[2].mxu1 %vm481_vm2, %v1199_v30  ;;  %1260 = vmatprep.subr.mxu1 %v1456_v20 }
 0x17a   : > { %1262 = vmatprep.mubr.msk.f32.mxu1 %vm1457_vm0, %v1456_v20  ;;  %vm896_vm0 = vcmask 261120  }
 0x17b   : > { %v657_v33 = vpop.permute.xlu0 %656 }
 0x17c   : > { %1261 = vmatpush3.msk.msra.mxu1 %vm485_vm1, %v657_v33 }
 0x17d   : > { %1263 = vmatmul.mubr.msk.f32.vlgmr.msra.gmra.mrb[4].mxu1 %vm481_vm2, %v1203_v32  ;;  %779 = vmatprep.subr.bf16.mxu1 %v1386_v35  ;;  %vm878_vm2 = vcmask 130048  }
 0x17e   : > { %811 = vmatprep.mubr.bf16.mxu1 %v1458_v22  ;;  %780 = vmatpush1.bf16.msra.mxu1 %v1384_v34 }
 0x17f   : > { %781 = vmatprep.subr.bf16.mxu1 %v777_v44 }
 0x182   : > { %782 = vmatpush1.bf16.msra.mxu1 %v774_v45 }
 0x1d9   : > { %v555_v36 = vpop.f32.mrb[0].mxu1 }
 0x1da   : > { %v1254_v37 = vpop.f32.mrb[1].mxu1  ;;  %v556_v57 = vadd.f32 %v555_v36, %v480_v56 }
 0x1dc   : > { %v559_v59 = vmax.f32 %v556_v57, 0.0 }
 0x24c   : > { %v642_v47 = vpop.f32.mrb[2].mxu1 }
 0x24d   : > { %v643_v48 = vadd.f32 %v642_v47, %v567_v46  ;;  %v1259_v49 = vpop.f32.mrb[3].mxu1 }
 0x24f   : > { %v646_v50 = vmax.f32 %v643_v48, 0.0 }
 0x250   : > { %v729_v52 = vpop.f32.mrb[4].mxu1 }
 0x251   : > { %v730_v53 = vadd.f32 %v729_v52, %v654_v51  ;;  %735 = vrot.lane.b32.xlu0 %v646_v50, %s1462_s19  ;;  %v1264_v54 = vpop.f32.mrb[5].mxu1  ;;  %s1468_s19 = smov 16  }
 0x253   : > { %v733_v55 = vmax.f32 %v730_v53, 0.0 }
 0x255   : > { %739 = vrot.lane.b32.xlu1 %v733_v55, %s1463_s22  ;;  %s1469_s22 = smov 18  }
 0x259   : > { %866 = vrot.lane.b32.xlu1 %v865_v7, %s1464_s10  ;;  %s1477_s10 = smov [#allocation3]  }
 0x25d   : > { %893 = vrot.lane.b32.xlu1 %v1678_v11, %s1465_s17  ;;  %s1396_s17 = sshll.u32 %s1477_s10, 4  ;;  %s1397_s17 = int_to_ptr.vmem [resolvable:$false] %s1396_s17 }
 0x261   : > { %902 = vrot.lane.b32.xlu1 %v865_v7, %s1466_s18  ;;  %s1398_s18 = scalar_lea.vmem %s1397_s17, 512 }
 0x2c3   : > { %v736_v58 = vpop.permute.xlu0 %735 }
 0x2c4   : > { %v743_v60 = vsel %vm742_vm5, %v559_v59, %v736_v58  ;;  %vm924_vm5 = vcmask 1039360  }
 0x2c7   : > { %v740_v61 = vpop.permute.xlu1 %739 }
 0x2c8   : > { %v745_v62 = vsel %vm744_vm6, %v743_v60, %v740_v61  ;;  %vm965_vm6 = vcmask 908288  }
 0x2c9   : > { %v746_v63 = vpack.c.bf16 %v745_v62, %v745_v62 }
 0x2cb   : > { %1211 = vmatmul.mubr.msk.bf16.vlgmr.msra.gmra.mrb[8].mxu1 %vm765_vm7, %v746_v63  ;;  %v867_v21 = vpop.permute.xlu1 %866  ;;  %v1039_v63 = vld [vmem:[%s1803_s6] sm:$0xff]  ;;  %vm938_vm7 = vcmask 1031168  }
 0x2cc   : > { %1087 = vmatprep.mubr.bf16.mxu1 %v1458_v22  ;;  %v868_v26 = vrot.slane %v867_v21, 4 }
 0x2ce   : > { %v870_v34 = vsel %vm869_vm15, %v868_v26, %v867_v21 }
 0x2cf   : > { %v894_v27 = vpop.permute.xlu1 %893 }
 0x2d0   : > { %v895_v29 = vrot.slane %v894_v27, 4 }
 0x2d2   : > { %v897_v35 = vsel %vm896_vm0, %v895_v29, %v894_v27 }
 0x2d3   : > { %v903_v43 = vpop.permute.xlu1 %902 }
 0x2d4   : > { %v904_v50 = vrot.slane %v903_v43, 4 }
 0x2d6   : > { %v906_v55 = vsel %vm905_vm4, %v904_v50, %v903_v43 }
 0x39e   : > { %v813_v12 = vpop.f32.mrb[8].mxu1 }
 0x39f   : > { %v815_v13 = vpop.f32.mrb[9].mxu1 }
 0x3a0   : > { %v826_v14 = vcombine.low %v813_v12, %v815_v13  ;;  %v817_v15 = vpop.f32.mrb[10].mxu1 }
 0x3a1   : > { %v818_v16 = vpop.f32.mrb[11].mxu1 }
 0x3a2   : > { %827 = vrot.lane.b32.xlu0 %v826_v14, %s1467_s20 }
 0x3a6   : > { %875 = vrot.lane.b32.xlu0 %v1678_v11, %s1468_s19  ;;  %s296_s19 = sand.u32 1, %s1446_s28  }
 0x3aa   : > { %884 = vrot.lane.b32.xlu0 %v865_v7, %s1469_s22  ;;  %s1178_s22 = sshll.u32 %s296_s19, 4 }
 0x414   : > { %v828_v17 = vpop.permute.xlu0 %827 }
 0x415   : > { %v829_v18 = vrot.slane %v828_v17, 4 }
 0x417   : > { %v831_v19 = vsel %vm830_vm12, %v829_v18, %v828_v17  ;;  %838 = vst.msk [vmem:[#allocation2 + $0x8] sm:$0xf] %vm820_vm8, %v829_v18  ;;  %vm953_vm8 = vcmask 916480   ;;  %vm1019_vm12 = vcmask 769024  }
 0x418   : > { %837 = vst.msk [vmem:[#allocation2] sm:$0xff] %vm836_vm13, %v831_v19  ;;  %v876_v20 = vpop.permute.xlu0 %875  ;;  %vm1045_vm13 = vcmask 293888  }
 0x419   : > { %v877_v30 = vrot.slane %v876_v20, 4 }
 0x41b   : > { %v879_v36 = vsel %vm878_vm2, %v877_v30, %v876_v20 }
 0x41c   : > { %v885_v22 = vpop.permute.xlu0 %884 }
 0x41d   : > { %v886_v25 = vrot.slane %v885_v22, 4 }
 0x41e   : > { %v1686_v23 = vld [vmem:[#allocation2 + $0x8] sm:$0xf] }
 0x41f   : > { %v1688_v24 = vld [vmem:[#allocation2] sm:$0xff]  ;;  %v917_v28 = vcombine.low %v1686_v23, %v1686_v23  ;;  %v888_v31 = vsel %vm887_vm14, %v886_v25, %v885_v22  ;;  %v892_v32 = vmul.f32 %v886_v25, %v1686_v23  ;;  %v883_v37 = vmul.f32 %v877_v30, %v1686_v23 }
 0x420   : > { %959 = vrot.lane.b32.xlu0 %v1688_v24, %s1470_s23  ;;  %v891_v38 = vmul.f32 %v888_v31, %v1688_v24  ;;  %v916_v40 = vcombine.low %v1688_v24, %v1688_v24  ;;  %v873_v41 = vmul.f32 %v870_v34, %v1688_v24  ;;  %v958_v42 = vcombine.high %v1688_v24, %v1688_v24 }
 0x421   : > { %v1331_v33 = vpack.i.bf16 %v917_v28, %v1688_v24  ;;  %v973_v39 = vcombine.low %v892_v32, %v892_v32  ;;  %v900_v44 = vmul.f32 %v897_v35, %v1688_v24  ;;  %v882_v45 = vmul.f32 %v879_v36, %v1688_v24 }
 0x422   : > { %v946_v46 = vcombine.low %v883_v37, %v883_v37  ;;  %v1336_v48 = vpack.i.bf16 %v1686_v23, %v958_v42  ;;  %v931_v49 = vcombine.high %v873_v41, %v873_v41  ;;  %v874_v51 = vmul.f32 %v868_v26, %v1686_v23 }
 0x423   : > { %1332 = vrot.lane.b32.xlu1 %v1331_v33, %s1471_s24  ;;  %v1346_v47 = vpack.i.bf16 %v973_v39, %v891_v38  ;;  %v987_v52 = vcombine.high %v900_v44, %v900_v44  ;;  %v901_v56 = vmul.f32 %v895_v29, %v1686_v23  ;;  %v909_v57 = vmul.f32 %v906_v55, %v1688_v24 }
 0x424   : > { %1327 = vrot.lane.b32.xlu0 %v1331_v33, %s1459_s21  ;;  %v1351_v53 = vpack.i.bf16 %v874_v51, %v931_v49  ;;  %v1341_v54 = vpack.i.bf16 %v946_v46, %v882_v45  ;;  %v945_v58 = vcombine.low %v882_v45, %v882_v45  ;;  %v972_v61 = vcombine.low %v891_v38, %v891_v38 }
 0x425   : > { %v1356_v59 = vpack.i.bf16 %v901_v56, %v987_v52  ;;  %v1012_v60 = vcombine.high %v909_v57, %v909_v57  ;;  %v910_v0 = vmul.f32 %v904_v50, %v1686_v23  ;;  %v854_v8 = vmul.f32 %v1678_v11, %v1688_v24 }
 0x427   : > { %918 = vrot.lane.b32.xlu1 %v916_v40, %s1459_s21  ;;  %s1474_s21 = smov 112   ;;  %v1361_v62 = vpack.i.bf16 %v1012_v60, %v909_v57  ;;  %v912_v13 = vcombine.high %v854_v8, %v854_v8 }
 0x428   : > { %932 = vrot.lane.b32.xlu0 %v873_v41, %s1472_s25 }
 0x42b   : > { %1347 = vrot.lane.b32.xlu1 %v1346_v47, %s1473_s26 }
 0x42c   : > { %1337 = vrot.lane.b32.xlu0 %v1336_v48, %s1470_s23  ;;  %s1221_s23 = sshll.u32 %s1544_s9, 8  ;;  %s1101_s9 = scalar_lea.sflag [#allocation4], %s296_s19 }
 0x42f   : > { %1352 = vrot.lane.b32.xlu1 %v1351_v53, %s1472_s25 }
 0x430   : > { %1342 = vrot.lane.b32.xlu0 %v1341_v54, %s1474_s21 }
 0x433   : > { %947 = vrot.lane.b32.xlu1 %v945_v58, %s1474_s21 }
 0x434   : > { %1357 = vrot.lane.b32.xlu0 %v1356_v59, %s1475_s12 }
 0x437   : > { %999 = vrot.lane.b32.xlu1 %v916_v40, %s1471_s24  ;;  %s298_s24 = scalar_lea.vmem [#allocation3], %s1178_s22 }
 0x438   : > { %988 = vrot.lane.b32.xlu0 %v900_v44, %s1475_s12  ;;  %s1115_s25 = sshll.u32 %s298_s24, 4  ;;  %s1755_s12 = scalar_lea.hbm %s1805_s8, %s1221_s23  ;;  %s1757_s25 = int_to_ptr.vmem [resolvable:$true] %s1115_s25 }
 0x439   : > { %p1399_p0 = scmp.lt.s32.totalorder %s1757_s25, %s1397_s17 }
 0x43b   : > { %974 = vrot.lane.b32.xlu1 %v972_v61, %s1473_s26 }
 0x43c   : > { %1362 = vrot.lane.b32.xlu0 %v1361_v62, %s1476_s13 }
 0x43f   : > { %1017 = vrot.lane.b32.xlu1 %v910_v0, %s1476_s13  ;;  %s1392_s13 = scalar_lea.vmem %s1757_s25, 256 }
 0x440   : > { %1042 = vperm.xlu0 %1366, %v1039_v63   ;;  %p1393_p11 = scmp.ne.s32.totalorder %s1757_s25, %s1392_s13  ;;  %p1400_p1 = scmp.lt.s32.totalorder %s1398_s18, %s1392_s13 }
 0x442   : > { %p1394_p12 = pnand %p1393_p11, %p1561_p5  ;;  %p1401_p2 = por %p1400_p1, %p1399_p0 }
 0x444   : > { %p1395_p13 = pneg %p1394_p12 }
 0x446   : > { %p1402_p3 = pnand %p1401_p2, %p1395_p13 }
 0x492   : > { %v1718_v1 = vpop.permute.xlu0 %959 }
 0x495   : > { %v1333_v2 = vpop.permute.xlu1 %1332 }
 0x496   : > { %v1328_v3 = vpop.permute.xlu0 %1327  ;;  %v1335_v23 = vunpack.i.h.bf16 %v1333_v2  ;;  %v1334_v24 = vunpack.i.l.bf16 %v1333_v2 }
 0x497   : > { %v1330_v6 = vunpack.i.h.bf16 %v1328_v3  ;;  %v1329_v7 = vunpack.i.l.bf16 %v1328_v3 }
 0x498   : > { %v1007_v42 = vsel %vm1005_vm10, %v1334_v24, %v1335_v23 }
 0x499   : > { %v919_v4 = vpop.permute.xlu1 %918  ;;  %v926_v12 = vsel %vm924_vm5, %v1329_v7, %v1330_v6 }
 0x49a   : > { %v933_v5 = vpop.permute.xlu0 %932  ;;  %v925_v25 = vsel %vm924_vm5, %v919_v4, %v1329_v7  ;;  %v1025_v28 = vsel %vm485_vm1, %v912_v13, %v926_v12 }
 0x49b   : > { %v1024_v39 = vsel %vm485_vm1, %v854_v8, %v925_v25 }
 0x49d   : > { %v1348_v9 = vpop.permute.xlu1 %1347 }
 0x49e   : > { %v1338_v10 = vpop.permute.xlu0 %1337  ;;  %v1350_v14 = vunpack.i.h.bf16 %v1348_v9  ;;  %v1349_v15 = vunpack.i.l.bf16 %v1348_v9 }
 0x49f   : > { %v1340_v16 = vunpack.i.h.bf16 %v1338_v10  ;;  %v1339_v17 = vunpack.i.l.bf16 %v1338_v10 }
 0x4a0   : > { %v982_v34 = vsel %vm980_vm9, %v1349_v15, %v1350_v14 }
 0x4a1   : > { %v1353_v18 = vpop.permute.xlu1 %1352  ;;  %v967_v29 = vsel %vm965_vm6, %v1339_v17, %v1340_v16  ;;  %v966_v53 = vsel %vm965_vm6, %v1718_v1, %v1339_v17  ;;  %v1032_v1 = vld [vmem:[%s1802_s5] sm:$0xf] }
 0x4a2   : > { %v1343_v19 = vpop.permute.xlu0 %1342  ;;  %v1355_v20 = vunpack.i.h.bf16 %v1353_v18  ;;  %v1354_v21 = vunpack.i.l.bf16 %v1353_v18  ;;  %v1029_v46 = vsel %vm485_vm1, %v967_v29, %v982_v34 }
 0x4a3   : > { %v1345_v22 = vunpack.i.h.bf16 %v1343_v19  ;;  %v1344_v11 = vunpack.i.l.bf16 %v1343_v19 }
 0x4a4   : > { %v940_v26 = vsel %vm938_vm7, %v1354_v21, %v1355_v20  ;;  %v939_v31 = vsel %vm938_vm7, %v933_v5, %v1354_v21 }
 0x4a5   : > { %v955_v27 = vsel %vm953_vm8, %v1344_v11, %v1345_v22  ;;  %v948_v30 = vpop.permute.xlu1 %947 }
 0x4a6   : > { %v1358_v32 = vpop.permute.xlu0 %1357  ;;  %v1027_v33 = vsel %vm485_vm1, %v940_v26, %v955_v27  ;;  %v954_v35 = vsel %vm953_vm8, %v948_v30, %v1344_v11 }
 0x4a7   : > { %v1360_v36 = vunpack.i.h.bf16 %v1358_v32  ;;  %v1359_v37 = vunpack.i.l.bf16 %v1358_v32  ;;  %v1034_v38 = vpack.c.bf16 %v1027_v33, %v1025_v28  ;;  %v1026_v40 = vsel %vm485_vm1, %v939_v31, %v954_v35 }
 0x4a8   : > { %v1033_v41 = vpack.c.bf16 %v1026_v40, %v1024_v39 }
 0x4a9   : > { %1055 = vmatprep.subr.bf16.mxu1 %v1034_v38  ;;  %v996_v43 = vsel %vm994_vm11, %v1359_v37, %v1360_v36  ;;  %v1000_v44 = vpop.permute.xlu1 %999 }
 0x4aa   : > { %v989_v45 = vpop.permute.xlu0 %988  ;;  %v1031_v47 = vsel %vm485_vm1, %v996_v43, %v1007_v42  ;;  %1056 = vmatpush1.bf16.msra.mxu1 %v1033_v41  ;;  %v1006_v49 = vsel %vm1005_vm10, %v1000_v44, %v1334_v24 }
 0x4ab   : > { %v1036_v48 = vpack.c.bf16 %v1031_v47, %v1029_v46  ;;  %v995_v50 = vsel %vm994_vm11, %v989_v45, %v1359_v37 }
 0x4ac   : > { %v1030_v57 = vsel %vm485_vm1, %v995_v50, %v1006_v49 }
 0x4ad   : > { %1057 = vmatprep.subr.bf16.mxu1 %v1036_v48  ;;  %v975_v51 = vpop.permute.xlu1 %974 }
 0x4ae   : > { %v1363_v52 = vpop.permute.xlu0 %1362  ;;  %v981_v54 = vsel %vm980_vm9, %v975_v51, %v1349_v15 }
 0x4af   : > { %v1365_v55 = vunpack.i.h.bf16 %v1363_v52  ;;  %v1364_v56 = vunpack.i.l.bf16 %v1363_v52  ;;  %v1028_v58 = vsel %vm485_vm1, %v966_v53, %v981_v54 }
 0x4b0   : > { %v1035_v59 = vpack.c.bf16 %v1030_v57, %v1028_v58 }
 0x4b1   : > { %v1020_v60 = vsel %vm1019_vm12, %v1364_v56, %v1365_v55  ;;  %v1018_v61 = vpop.permute.xlu1 %1017 }
 0x4b2   : > { %v1037_v62 = vpack.c.bf16 %v1020_v60, %v1020_v60  ;;  %v1021_v63 = vsel %vm1019_vm12, %v1365_v55, %v1018_v61  ;;  %1058 = vmatpush1.bf16.msra.mxu1 %v1035_v59 }
 0x4b3   : > { %v1038_v0 = vpack.c.bf16 %v1021_v63, %v1021_v63 }
 0x4b4   : > { %v1050_v2 = vsel %vm769_vm3, %v1037_v62, 0 }
 0x4b5   : > { %1213 = vmatprep.subr.msk.bf16.mxu1 %vm769_vm3, %v1038_v0 }
 0x4b6   : > { %1060 = vmatpush1.bf16.msra.mxu1 %v1050_v2 }
 0x4b9   : > { %1214 = vmatmul.mubr.msk.bf16.vlgmr.msra.gmra.mrb[12].mxu1 %vm1045_vm13, %v1032_v1 }
 0x4bf   : > { %v1043_v3 = vpop.permute.xlu0 %1042 }
 0x58c   : > { %v1089_v4 = vpop.f32.mrb[12].mxu1 }
 0x58d   : > { %v1091_v5 = vpop.f32.mrb[13].mxu1  ;;  %v1090_v6 = vadd.f32 %v1089_v4, %v1043_v3 }
 0x58e   : > { %v1093_v7 = vpop.f32.mrb[14].mxu1  ;;  %v1092_v8 = vadd.f32 %v1091_v5, %v1043_v3 }
 0x58f   : > { %v1096_v9 = vmax.f32 %v1090_v6, 0.0  ;;  %v1094_v10 = vpop.f32.mrb[15].mxu1 }
 0x590   : > { %v1097_v12 = vmax.f32 %v1092_v8, 0.0 }
 0x591   : > { %1098 = vst [vmem:[%s298_s24] sm:$0xff] %v1096_v9 }
 0x592   : > { %1099 = vst [vmem:[%s298_s24 + $0x8] sm:$0xff] %v1097_v12 }
 0x593   : > { %1405 = shalt.err (!%p1402_p3)
}
 0x594   : > { %s1406_s20 = scalar_lea.hbm %s1755_s12, 256  ;;  %s1410_s23 = scalar_lea.hbm %s1805_s8, 512 }
 0x595   : > { %p1407_p4 = scmp.ne.s32.totalorder %s1755_s12, %s1406_s20  ;;  %p1411_p9 = scmp.lt.u32.totalorder %s1755_s12, %s1805_s8 }
 0x596   : > { %p1412_p10 = scmp.lt.u32.totalorder %s1410_s23, %s1406_s20  ;;  %p1414_p12 = scmp.lt.u32.totalorder %s1406_s20, %s1755_s12 }
 0x597   : > { %p1408_p7 = pnand %p1407_p4, %p1561_p5 }
 0x598   : > { %p1413_p11 = por %p1412_p10, %p1411_p9 }
 0x599   : > { %p1409_p8 = pneg %p1408_p7 }
 0x59a   : > { %p1415_p13 = por %p1414_p12, %p1413_p11 }
 0x59c   : > { %p1416_p0 = pnand %p1415_p13, %p1409_p8 }
 0x59e   : > { %1419 = shalt.err (!%p1416_p0)
}
 0x59f   : > { %1265 = dma.vmem_to_hbm [thread:$0]  (%p1561_p5), %s1757_s25, 256, %s1755_s12, %s1101_s9  }
 0x5a0 PF: > { %p1271_p1 = scmp.ge.s32.totalorder %s1454_s30, 2  ;;  %s1127_s21 = sand.u32 1, %s1442_s27  }
 0x5a1   : > { %s1128_s13 = scalar_lea.sflag [#allocation4], %s1127_s21 }
 0x5a2   : > { %p1268_p2 = pnand %p1271_p1, %p1565_p6 }
 0x5a4   : > { %1437 = dma.done.wait (!%p1268_p2), %s1128_s13, 256  }
 0x5a5   : > { %1439 = vsyncadd (!%p1268_p2), %s1128_s13, 4294967040  ;;  %p18_p3 = scmp.ge.s32.totalorder %s1548_s11, 4   ;;  %s1808_s27 = smov %s1446_s28 }
 0x5a6   : > { %s1809_s28 = smov %s1450_s29  ;;  %s1810_s29 = smov %s1559_s14 }
 0x5a7   : > { %s1811_s30 = smov %s1548_s11  ;;  %20 = sbr.rel (!%p18_p3) target bundleno = 3 (0x3), region = 92 }
 0x5ae   :  { %1133 = vsyncpa [#allocation4], 1 }
 0x5af   :  { %1135 = vsyncpa [#allocation4 + $0x1], 1 }

</bundles_post_ra>
